<compile_context>
chip_gen: v5e
topology: v5e:2x2
jax: 0.10.0
libtpu: 0.0.40
codegen_flags: <defaults>
</compile_context>

<pallas_src>
import math

import jax
import jax.numpy as jnp
from jax.experimental import pallas as pl
from jax.experimental.pallas import tpu as pltpu

_MIB = 1024 * 1024


def _decoder_kernel(x_ref, w_ref, b_ref, o_ref):
    # x_ref: (T, P*D) VMEM | w_ref: (P*D, P) VMEM (resident) | b_ref: (1,) f32 SMEM
    # o_ref: (T, P) VMEM  — element (t, p) is the decode of original row t*P + p.
    y = jnp.dot(
        x_ref[...],
        w_ref[...],
        preferred_element_type=jnp.float32,
        precision=jax.lax.Precision.HIGHEST,   # keep f32 accuracy on the MXU
    )
    o_ref[...] = (y + b_ref[0]).astype(o_ref.dtype)


def _round_up(v, m):
    return ((v + m - 1) // m) * m


def _vmem_budget_bytes():
    """Generation-aware usable-VMEM budget (~75% of per-core physical VMEM)."""
    try:
        info = pltpu.get_tpu_info()
        cap = int(getattr(info, "vmem_capacity_bytes", 128 * _MIB))
    except Exception:
        cap = 64 * _MIB  # conservative (v7x-sized) fallback
    return (cap * 3) // 4  # ~48 MiB on v7x (64 MiB), ~96 MiB on v5e/v6e (128 MiB)


def decoder_forward(x, weight, bias, *, target_block_bytes=4 * _MIB):
    """x: [*, D]; weight: [1, D] or [D]; bias: [1] or scalar  ->  [*] (x.dtype)."""
    D = x.shape[-1]
    lead_shape = x.shape[:-1]
    dtype = x.dtype
    itemsize = jnp.dtype(dtype).itemsize

    x2 = x.reshape(-1, D)
    n = x2.shape[0]

    # --- lane packing factor -------------------------------------------------
    P = 128 // D if (D <= 128 and 128 % D == 0) else 1
    PD = P * D

    # Pad rows only up to the packing factor (< P extra zero rows).
    n_pad = _round_up(max(n, 1), P)
    if n_pad != n:
        x2 = jnp.pad(x2, ((0, n_pad - n), (0, 0)))
    x_packed = x2.reshape(n_pad // P, PD)      # row-major reshape: no data movement
    n_rows = x_packed.shape[0]

    # --- block-diagonal weight (P*D, P); column p = weight in segment p ------
    w_col = weight.reshape(D).astype(jnp.float32)
    ws = (jnp.eye(P, dtype=jnp.float32)[:, None, :] * w_col[None, :, None])
    ws = ws.reshape(PD, P).astype(dtype)
    b_f32 = bias.reshape(1).astype(jnp.float32)   # 32-bit scalar for SMEM

    # --- tile sizing: by bytes, capped by generation-aware VMEM budget -------
    row_hbm_bytes = PD * itemsize
    row_vmem_bytes = _round_up(PD, 128) * itemsize   # lane axis pads to 128
    budget = _vmem_budget_bytes()
    weight_bytes = PD * P * itemsize
    margin = 4 * _MIB                                # out double-buffer + scratch
    in_budget = max(budget - weight_bytes - margin, 2 * 8 * row_vmem_bytes)

    tile = min(target_block_bytes // row_hbm_bytes,
               in_budget // (2 * row_vmem_bytes))    # input is double-buffered
    tile = max(8, (tile // 8) * 8)
    if n_rows <= 8:
        tile = n_rows                                # single full-extent block
    else:
        # Ensure >= 2 (roughly balanced) blocks so both v7x TensorCores work.
        tile = min(tile, _round_up(pl.cdiv(n_rows, 2), 8))
    num_blocks = pl.cdiv(n_rows, tile)

    out = pl.pallas_call(
        _decoder_kernel,
        out_shape=jax.ShapeDtypeStruct((n_rows, P), dtype),
        grid_spec=pltpu.PrefetchScalarGridSpec(
            num_scalar_prefetch=0,
            grid=(num_blocks,),
            in_specs=[
                pl.BlockSpec((tile, PD), lambda i: (i, 0)),           # streamed rows
                pl.BlockSpec((PD, P), lambda i: (0, 0)),              # resident weight
                pl.BlockSpec(memory_space=pltpu.MemorySpace.SMEM),    # f32 bias scalar
            ],
            out_specs=pl.BlockSpec((tile, P), lambda i: (i, 0)),
        ),
        compiler_params=pltpu.CompilerParams(
            dimension_semantics=("parallel",),       # shard row blocks across TCs
            vmem_limit_bytes=int(budget),
        ),
    )(x_packed, ws, b_f32)

    # Edge-block / packing-pad rows are sliced off here (never observed).
    return out.reshape(-1)[:n].reshape(lead_shape)


def init_decoder_params(encode_dim, key, dtype=jnp.float32):
    # Deterministic init matching nn.Linear's default U(-1/sqrt(D), 1/sqrt(D)).
    kw, kb = jax.random.split(key)
    bound = 1.0 / math.sqrt(encode_dim)
    weight = jax.random.uniform(kw, (1, encode_dim), dtype, -bound, bound)
    bias = jax.random.uniform(kb, (1,), dtype, -bound, bound)
    return weight, bias


if __name__ == "__main__":
    key = jax.random.PRNGKey(0)
    kx, kp, kx2 = jax.random.split(key, 3)

    # x: [*, encode_dim] = [2, 8, 32]  ->  out: [2, 8]
    batch, seq, encode_dim = 2, 8, 32
    x = jax.random.normal(kx, (batch, seq, encode_dim), jnp.float32)
    weight, bias = init_decoder_params(encode_dim, kp)

    out = jax.block_until_ready(decoder_forward(x, weight, bias))
    ref = (x.reshape(-1, encode_dim) @ weight.reshape(encode_dim, 1)
           + bias).reshape(batch, seq)
    assert out.shape == (batch, seq), out.shape
    assert jnp.allclose(out, ref, atol=1e-4, rtol=1e-4), "mismatch vs reference"

    # Second check: packing pad (37 % 4 != 0), multi-block grid, edge block.
    n_rows = 37
    x_b = jax.random.normal(kx2, (n_rows, encode_dim), jnp.float32)
    out_b = jax.block_until_ready(decoder_forward(x_b, weight, bias))
    ref_b = (x_b @ weight.reshape(encode_dim, 1) + bias).reshape(n_rows)
    assert out_b.shape == (n_rows,), out_b.shape
    assert jnp.allclose(out_b, ref_b, atol=1e-4, rtol=1e-4), "mismatch (edge blocks)"

    print("KERNEL_OK")
</pallas_src>

<mosaic_0001>
module attributes {stable_mosaic.version = 11 : i64} {
  func.func @_decoder_kernel(%arg0: i32, %arg1: memref<4x128xf32, #tpu.memory_space<vmem>>, %arg2: memref<128x4xf32, #tpu.memory_space<vmem>>, %arg3: memref<1xf32, #tpu.memory_space<smem>>, %arg4: memref<4x4xf32, #tpu.memory_space<vmem>>) attributes {dimension_semantics = [#tpu.dimension_semantics<parallel>], iteration_bounds = array<i64: 1>, scalar_prefetch = 0 : i64, scratch_operands = 0 : i64, tpu.core_type = #tpu.core_type<tc>, window_params = [{transform_indices = @transform_0, window_bounds = array<i64: 4, 128>}, {pipeline_mode = #tpu.pipeline_mode<synchronous>, transform_indices = @transform_1, window_bounds = array<i64: 128, 4>}, {transform_indices = @transform_2, window_bounds = array<i64: 1>}, {transform_indices = @transform_3, window_bounds = array<i64: 4, 4>}]} {
    %c0 = arith.constant 0 : index
    %c0_0 = arith.constant 0 : index
    %0 = vector.load %arg1[%c0, %c0_0] : memref<4x128xf32, #tpu.memory_space<vmem>>, vector<4x128xf32>
    %c0_1 = arith.constant 0 : index
    %c0_2 = arith.constant 0 : index
    %1 = vector.load %arg2[%c0_1, %c0_2] : memref<128x4xf32, #tpu.memory_space<vmem>>, vector<128x4xf32>
    %cst = arith.constant dense<0.000000e+00> : vector<4x4xf32>
    %2 = tpu.matmul %0, %1, %cst {dimension_numbers = #tpu.dot_dimension_numbers<[1], [0], [0], [1], [0, 0, 1, 1], [], []>, precision = #tpu.contract_precision<fp32>} : vector<4x128xf32>, vector<128x4xf32>, vector<4x4xf32> -> vector<4x4xf32>
    %c0_3 = arith.constant 0 : index
    %3 = memref.load %arg3[%c0_3] : memref<1xf32, #tpu.memory_space<smem>>
    %4 = vector.broadcast %3 : f32 to vector<4x4xf32>
    %5 = arith.addf %2, %4 : vector<4x4xf32>
    %c0_4 = arith.constant 0 : index
    %c0_5 = arith.constant 0 : index
    %6 = vector.load %arg4[%c0_4, %c0_5] : memref<4x4xf32, #tpu.memory_space<vmem>>, vector<4x4xf32>
    tpu.vector_store %arg4[%c0_4, %c0_5], %5 {strides = array<i32>} : memref<4x4xf32, #tpu.memory_space<vmem>>, vector<4x4xf32>,
    return
  }
  func.func @transform_0(%arg0: i32) -> (i32, i32) {
    %c0_i32 = arith.constant 0 : i32
    %c0_i32_0 = arith.constant 0 : i32
    return %arg0, %c0_i32 : i32, i32
  }
  func.func @transform_1(%arg0: i32) -> (i32, i32) {
    %c0_i32 = arith.constant 0 : i32
    %c0_i32_0 = arith.constant 0 : i32
    %c0_i32_1 = arith.constant 0 : i32
    return %c0_i32, %c0_i32_0 : i32, i32
  }
  func.func @transform_2(%arg0: i32) -> i32 {
    %c0_i32 = arith.constant 0 : i32
    %c0_i32_0 = arith.constant 0 : i32
    return %c0_i32 : i32
  }
  func.func @transform_3(%arg0: i32) -> (i32, i32) {
    %c0_i32 = arith.constant 0 : i32
    %c0_i32_0 = arith.constant 0 : i32
    return %arg0, %c0_i32 : i32, i32
  }
}

</mosaic_0001>

<bundles_post_ra>
// kernel: tpu_custom_call.1
= control target key start
LH: loop header
LB: loop body
LE: loop exit
PB: predicated region body
PF: predicated region fallthrough
CT: control target
= control target key end

     0   :  { %s737_s0 = inlined_call_operand.vmem [shape: f32[4,128], index: 0, kind: input, shape index: {}]   ;;  %s738_s1 = inlined_call_operand.vmem [shape: f32[128,4], index: 1, kind: input, shape index: {}]   ;;  %s739_s2 = inlined_call_operand.<no memory space> [shape: f32[1], index: 2, kind: input, shape index: {}]   ;;  %s740_s3 = inlined_call_operand.hbm [shape: f32[4,4], index: 3, kind: output, shape index: {}]  }
   0x1   :  { %v32_v0 = vld [vmem:[%s738_s1 + $0x78] sm:$0xff]  ;;  %v31_v1 = vld [vmem:[%s738_s1 + $0x70] sm:$0xff]  ;;  %v30_v2 = vld [vmem:[%s738_s1 + $0x68] sm:$0xff] }
   0x2   :  { %v451_v3 = vand.u32 4294901760, %v32_v0  ;;  %v453_v4 = vand.u32 4294901760, %v31_v1  ;;  %v455_v5 = vand.u32 4294901760, %v30_v2  ;;  %v29_v6 = vld [vmem:[%s738_s1 + $0x60] sm:$0xff]  ;;  %v28_v7 = vld [vmem:[%s738_s1 + $0x58] sm:$0xff]  ;;  %v27_v8 = vld [vmem:[%s738_s1 + $0x50] sm:$0xff] }
   0x3   :  { %v466_v9 = vand.u32 4294901760, %v29_v6  ;;  %v468_v10 = vand.u32 4294901760, %v28_v7  ;;  %v470_v11 = vand.u32 4294901760, %v27_v8  ;;  %v26_v12 = vld [vmem:[%s738_s1 + $0x48] sm:$0xff]  ;;  %v25_v13 = vld [vmem:[%s738_s1 + $0x40] sm:$0xff]  ;;  %v24_v21 = vld [vmem:[%s738_s1 + $0x38] sm:$0xff] }
   0x4   :  { %36 = vmatpush.msra.mxu0 %v451_v3  ;;  %v480_v14 = vsub.f32 %v32_v0, %v451_v3  ;;  %v483_v15 = vsub.f32 %v31_v1, %v453_v4  ;;  %v486_v16 = vsub.f32 %v30_v2, %v455_v5  ;;  %v488_v17 = vand.u32 4294901760, %v26_v12  ;;  %232 = vmatpush.msra.mxu3 %v451_v3 }
   0x5   :  { %v492_v18 = vsub.f32 %v29_v6, %v466_v9  ;;  %v495_v19 = vsub.f32 %v28_v7, %v468_v10  ;;  %v497_v20 = vand.u32 4294901760, %v25_v13  ;;  %v507_v25 = vsub.f32 %v27_v8, %v470_v11 }
   0x6   :  { %38 = vmatpush.msra.mxu0 %v453_v4  ;;  %v78_v22 = vand.u32 4294901760, %v480_v14  ;;  %v84_v23 = vand.u32 4294901760, %v483_v15  ;;  %v90_v24 = vand.u32 4294901760, %v486_v16  ;;  %179 = vmatpush.msra.mxu2 %v480_v14 }
   0x7   :  { %9 = vsyncpa [#allocation4], 0  ;;  %v96_v26 = vand.u32 4294901760, %v492_v18  ;;  %v102_v27 = vand.u32 4294901760, %v495_v19  ;;  %v513_v28 = vsub.f32 %v26_v12, %v488_v17  ;;  %234 = vmatpush.msra.mxu3 %v453_v4  ;;  %v526_v32 = vand.u32 4294901760, %v24_v21  ;;  %v23_v34 = vld [vmem:[%s738_s1 + $0x30] sm:$0xff] }
   0x8   :  { %v79_v29 = vsub.f32 %v480_v14, %v78_v22  ;;  %40 = vmatpush.msra.mxu0 %v455_v5  ;;  %v85_v30 = vsub.f32 %v483_v15, %v84_v23  ;;  %v91_v31 = vsub.f32 %v486_v16, %v90_v24  ;;  %182 = vmatpush.msra.mxu2 %v483_v15  ;;  %v22_v35 = vld [vmem:[%s738_s1 + $0x28] sm:$0xff]  ;;  %v108_v39 = vand.u32 4294901760, %v507_v25  ;;  %v21_v42 = vld [vmem:[%s738_s1 + $0x20] sm:$0xff]  ;;  %v20_v47 = vld [vmem:[%s738_s1 + $0x18] sm:$0xff]  ;;  %s421_s19 = smov [#allocation3]   ;;  %s385_s23 = sshll.u32 %s740_s3, 4  ;;  %s386_s23 = int_to_ptr.hbm [resolvable:$true] %s385_s23 }
   0x9   :  { %v530_v33 = vsub.f32 %v25_v13, %v497_v20  ;;  %236 = vmatpush.msra.mxu3 %v455_v5  ;;  %v97_v38 = vsub.f32 %v492_v18, %v96_v26  ;;  %v103_v40 = vsub.f32 %v495_v19, %v102_v27  ;;  %v114_v41 = vand.u32 4294901760, %v513_v28  ;;  %v19_v53 = vld [vmem:[%s738_s1 + $0x10] sm:$0xff]  ;;  %v18_v61 = vld [vmem:[%s738_s1 + $0x8] sm:$0xff]  ;;  %v17_v2 = vld [vmem:[%s738_s1] sm:$0xff]  ;;  %s383_s20 = sshll.u32 %s421_s19, 4  ;;  %s384_s20 = int_to_ptr.vmem [resolvable:$true] %s383_s20 }
   0xa   :  { %v80_v36 = vand.u32 4294901760, %v79_v29  ;;  %v86_v37 = vand.u32 4294901760, %v85_v30  ;;  %42 = vmatpush.msra.mxu0 %v466_v9  ;;  %185 = vmatpush.msra.mxu2 %v486_v16  ;;  %v92_v43 = vand.u32 4294901760, %v91_v31  ;;  %v554_v44 = vand.u32 4294901760, %v23_v34  ;;  %v16_v29 = vld [vmem:[%s737_s0] sm:$0xf] }
   0xb   :  { %238 = vmatpush.msra.mxu3 %v466_v9  ;;  %v557_v45 = vsub.f32 %v24_v21, %v526_v32  ;;  %v559_v46 = vand.u32 4294901760, %v22_v35  ;;  %v120_v48 = vand.u32 4294901760, %v530_v33  ;;  %v98_v49 = vand.u32 4294901760, %v97_v38 }
   0xc   :  { %81 = vmatpush.msra.mxu1 %v80_v36  ;;  %44 = vmatpush.msra.mxu0 %v468_v10  ;;  %v109_v50 = vsub.f32 %v507_v25, %v108_v39  ;;  %v572_v51 = vsub.f32 %v23_v34, %v554_v44  ;;  %v574_v52 = vand.u32 4294901760, %v21_v42  ;;  %v579_v54 = vand.u32 4294901760, %v20_v47 }
   0xd   :  { %188 = vmatpush.msra.mxu2 %v492_v18  ;;  %240 = vmatpush.msra.mxu3 %v468_v10  ;;  %v104_v55 = vand.u32 4294901760, %v103_v40  ;;  %v115_v56 = vsub.f32 %v513_v28, %v114_v41  ;;  %v126_v57 = vand.u32 4294901760, %v557_v45  ;;  %v589_v58 = vsub.f32 %v22_v35, %v559_v46 }
   0xe   :  { %87 = vmatpush.msra.mxu1 %v86_v37  ;;  %46 = vmatpush.msra.mxu0 %v470_v11  ;;  %v121_v59 = vsub.f32 %v530_v33, %v120_v48  ;;  %v594_v60 = vand.u32 4294901760, %v19_v53  ;;  %v110_v62 = vand.u32 4294901760, %v109_v50  ;;  %v132_v63 = vand.u32 4294901760, %v572_v51 }
   0xf   :  { %191 = vmatpush.msra.mxu2 %v495_v19  ;;  %242 = vmatpush.msra.mxu3 %v470_v11  ;;  %v604_v0 = vsub.f32 %v21_v42, %v574_v52  ;;  %v607_v1 = vsub.f32 %v20_v47, %v579_v54  ;;  %v116_v6 = vand.u32 4294901760, %v115_v56  ;;  %v127_v7 = vsub.f32 %v557_v45, %v126_v57 }
  0x10   :  { %93 = vmatpush.msra.mxu1 %v92_v43  ;;  %48 = vmatpush.msra.mxu0 %v488_v17  ;;  %v138_v8 = vand.u32 4294901760, %v589_v58  ;;  %v619_v12 = vand.u32 4294901760, %v18_v61  ;;  %v122_v13 = vand.u32 4294901760, %v121_v59  ;;  %v622_v21 = vsub.f32 %v19_v53, %v594_v60 }
  0x11   :  { %194 = vmatpush.msra.mxu2 %v507_v25  ;;  %244 = vmatpush.msra.mxu3 %v488_v17  ;;  %v133_v30 = vsub.f32 %v572_v51, %v132_v63  ;;  %v144_v31 = vand.u32 4294901760, %v604_v0  ;;  %v634_v34 = vand.u32 4294901760, %v17_v2  ;;  %v636_v35 = vand.u32 4294901760, %v16_v29 }
  0x12   :  { %99 = vmatpush.msra.mxu1 %v98_v49  ;;  %50 = vmatpush.msra.mxu0 %v497_v20  ;;  %v150_v36 = vand.u32 4294901760, %v607_v1  ;;  %v128_v37 = vand.u32 4294901760, %v127_v7  ;;  %v139_v38 = vsub.f32 %v589_v58, %v138_v8  ;;  %v646_v40 = vsub.f32 %v18_v61, %v619_v12 }
  0x13   :  { %197 = vmatpush.msra.mxu2 %v513_v28  ;;  %246 = vmatpush.msra.mxu3 %v497_v20  ;;  %v68_v42 = vsub.f32 %v16_v29, %v636_v35  ;;  %v134_v43 = vand.u32 4294901760, %v133_v30  ;;  %v145_v47 = vsub.f32 %v604_v0, %v144_v31  ;;  %v156_v49 = vand.u32 4294901760, %v622_v21 }
  0x14   :  { %105 = vmatpush.msra.mxu1 %v104_v55  ;;  %52 = vmatpush.msra.mxu0 %v526_v32  ;;  %v657_v50 = vsub.f32 %v17_v2, %v634_v34  ;;  %v140_v53 = vand.u32 4294901760, %v139_v38  ;;  %v151_v55 = vsub.f32 %v607_v1, %v150_v36  ;;  %v162_v56 = vand.u32 4294901760, %v646_v40 }
  0x15   :  { %200 = vmatpush.msra.mxu2 %v530_v33  ;;  %248 = vmatpush.msra.mxu3 %v526_v32  ;;  %v69_v59 = vand.u32 4294901760, %v68_v42  ;;  %v146_v61 = vand.u32 4294901760, %v145_v47  ;;  %vm376_vm0 = vcmask 27648  }
  0x16   :  { %111 = vmatpush.msra.mxu1 %v110_v62  ;;  %54 = vmatpush.msra.mxu0 %v554_v44  ;;  %v157_v62 = vsub.f32 %v622_v21, %v156_v49  ;;  %v168_v2 = vand.u32 4294901760, %v657_v50  ;;  %v163_v7 = vsub.f32 %v646_v40, %v162_v56 }
  0x17   :  { %203 = vmatpush.msra.mxu2 %v557_v45  ;;  %250 = vmatpush.msra.mxu3 %v554_v44 }
  0x18   :  { %117 = vmatpush.msra.mxu1 %v116_v6  ;;  %56 = vmatpush.msra.mxu0 %v559_v46  ;;  %v152_v6 = vand.u32 4294901760, %v151_v55  ;;  %v158_v29 = vand.u32 4294901760, %v157_v62  ;;  %v169_v30 = vsub.f32 %v657_v50, %v168_v2 }
  0x19   :  { %206 = vmatpush.msra.mxu2 %v572_v51  ;;  %252 = vmatpush.msra.mxu3 %v559_v46 }
  0x1a   :  { %123 = vmatpush.msra.mxu1 %v122_v13  ;;  %58 = vmatpush.msra.mxu0 %v574_v52  ;;  %v70_v13 = vsub.f32 %v68_v42, %v69_v59 }
  0x1b   :  { %209 = vmatpush.msra.mxu2 %v589_v58  ;;  %254 = vmatpush.msra.mxu3 %v574_v52 }
  0x1c   :  { %129 = vmatpush.msra.mxu1 %v128_v37  ;;  %60 = vmatpush.msra.mxu0 %v579_v54  ;;  %v164_v37 = vand.u32 4294901760, %v163_v7  ;;  %v71_v38 = vand.u32 4294901760, %v70_v13 }
  0x1d   :  { %212 = vmatpush.msra.mxu2 %v604_v0  ;;  %256 = vmatpush.msra.mxu3 %v579_v54 }
  0x1e   :  { %135 = vmatpush.msra.mxu1 %v134_v43  ;;  %62 = vmatpush.msra.mxu0 %v594_v60  ;;  %v170_v43 = vand.u32 4294901760, %v169_v30 }
  0x1f   :  { %215 = vmatpush.msra.mxu2 %v607_v1  ;;  %258 = vmatpush.msra.mxu3 %v594_v60 }
  0x20   :  { %141 = vmatpush.msra.mxu1 %v140_v53  ;;  %64 = vmatpush.msra.mxu0 %v619_v12 }
  0x21   :  { %218 = vmatpush.msra.mxu2 %v622_v21  ;;  %260 = vmatpush.msra.mxu3 %v619_v12 }
  0x22   :  { %147 = vmatpush.msra.mxu1 %v146_v61  ;;  %66 = vmatpush.msra.mxu0 %v634_v34 }
  0x23   :  { %221 = vmatpush.msra.mxu2 %v646_v40  ;;  %262 = vmatpush.msra.mxu3 %v634_v34 }
  0x24   :  { %273 = vmatpush.msrb.mxu0 %v78_v22  ;;  %153 = vmatpush.msra.mxu1 %v152_v6 }
  0x25   :  { %224 = vmatpush.msra.mxu2 %v657_v50  ;;  %266 = vmatmul.f32.vlgmr.msra.gmra.mxu3 %v69_v59 }
  0x26   :  { %277 = vmatpush.msrb.mxu0 %v84_v23  ;;  %159 = vmatpush.msra.mxu1 %v158_v29 }
  0x27   :  { %227 = vmatmul.f32.vlgmr.msra.gmra.mxu2 %v68_v42  ;;  %72 = vmatmul.f32.vlgmr.msra.gmra.mxu0 %v71_v38 }
  0x28   :  { %281 = vmatpush.msrb.mxu0 %v90_v24  ;;  %165 = vmatpush.msra.mxu1 %v164_v37 }
  0x2a   :  { %285 = vmatpush.msrb.mxu0 %v96_v26  ;;  %171 = vmatpush.msra.mxu1 %v170_v43 }
  0x2b   :  { %173 = vmatmul.f32.vlgmr.msra.gmra.mxu1 %v636_v35 }
  0x2c   :  { %340 = vmatpush.msrb.mxu1 %v451_v3  ;;  %289 = vmatpush.msrb.mxu0 %v102_v27  ;;  %v34_v3 = vstv %s739_s2 }
  0x2e   :  { %342 = vmatpush.msrb.mxu1 %v453_v4  ;;  %293 = vmatpush.msrb.mxu0 %v108_v39 }
  0x30   :  { %344 = vmatpush.msrb.mxu1 %v455_v5  ;;  %297 = vmatpush.msrb.mxu0 %v114_v41 }
  0x32   :  { %346 = vmatpush.msrb.mxu1 %v466_v9  ;;  %301 = vmatpush.msrb.mxu0 %v120_v48 }
  0x34   :  { %348 = vmatpush.msrb.mxu1 %v468_v10  ;;  %305 = vmatpush.msrb.mxu0 %v126_v57 }
  0x36   :  { %350 = vmatpush.msrb.mxu1 %v470_v11  ;;  %309 = vmatpush.msrb.mxu0 %v132_v63 }
  0x38   :  { %352 = vmatpush.msrb.mxu1 %v488_v17  ;;  %313 = vmatpush.msrb.mxu0 %v138_v8 }
  0x3a   :  { %354 = vmatpush.msrb.mxu1 %v497_v20  ;;  %317 = vmatpush.msrb.mxu0 %v144_v31 }
  0x3c   :  { %356 = vmatpush.msrb.mxu1 %v526_v32  ;;  %321 = vmatpush.msrb.mxu0 %v150_v36 }
  0x3e   :  { %358 = vmatpush.msrb.mxu1 %v554_v44  ;;  %325 = vmatpush.msrb.mxu0 %v156_v49 }
  0x40   :  { %360 = vmatpush.msrb.mxu1 %v559_v46  ;;  %329 = vmatpush.msrb.mxu0 %v162_v56 }
  0x42   :  { %362 = vmatpush.msrb.mxu1 %v574_v52  ;;  %333 = vmatpush.msrb.mxu0 %v168_v2 }
  0x43   :  { %335 = vmatmul.f32.vlgmr.msrb.gmra.mxu0 %v636_v35 }
  0x44   :  { %364 = vmatpush.msrb.mxu1 %v579_v54 }
  0x46   :  { %366 = vmatpush.msrb.mxu1 %v594_v60 }
  0x48   :  { %368 = vmatpush.msrb.mxu1 %v619_v12 }
  0x4a   :  { %370 = vmatpush.msrb.mxu1 %v634_v34 }
  0x4b   :  { %372 = vmatmul.f32.vlgmr.msrb.gmra.mxu1 %v636_v35 }
  0xa4   :  { %v73_v4 = vpop.f32.mrf.mxu0 }
  0xa5   :  { %v74_v5 = vadd.f32 %v73_v4, %v34_v3 }
  0xa8   :  { %v174_v9 = vpop.f32.mrf.mxu1  ;;  %v267_v15 = vpop.f32.mrf.mxu3 }
  0xa9   :  { %v175_v10 = vadd.f32 %v174_v9, %v74_v5 }
  0xaa   :  { %v228_v11 = vpop.f32.mrf.mxu2 }
  0xab   :  { %v229_v14 = vadd.f32 %v228_v11, %v175_v10 }
  0xad   :  { %v268_v16 = vadd.f32 %v267_v15, %v229_v14 }
  0xc0   :  { %v336_v17 = vpop.f32.mrf.mxu0 }
  0xc1   :  { %v337_v18 = vadd.f32 %v336_v17, %v268_v16 }
  0xc8   :  { %v373_v19 = vpop.f32.mrf.mxu1 }
  0xc9   :  { %v374_v20 = vadd.f32 %v373_v19, %v337_v18 }
  0xcb   :  { %377 = vst.msk [vmem:[#allocation3] sm:$0xf] %vm376_vm0, %v374_v20 }
  0xcc   :  { %388 = dma.vmem_to_hbm [thread:$0]  %s384_s20, 64, %s386_s23, [#allocation4]  }
  0xcd   :  { %419 = dma.done.wait [#allocation4], 64  }
  0xce   :  { %420 = vsyncadd [#allocation4], 4294967232 }
  0xcf   :  { %393 = vsyncpa [#allocation4], 1 }

</bundles_post_ra>
